<compile_context>
chip_gen: v5e
topology: v5e:2x2
jax: 0.10.0
libtpu: 0.0.40
codegen_flags: <defaults>
</compile_context>

<pallas_src>
import jax
import jax.numpy as jnp
from jax.experimental import pallas as pl
from jax.experimental.pallas import tpu as pltpu


def _square_kernel(x_ref, o_ref):
    # Minimal hot path: one full-tile VPU multiply, hidden under DMA traffic.
    v = x_ref[...]
    o_ref[...] = v * v


_LANE = 128
_SUBLANE_GRANULE = {4: 8, 2: 16, 1: 32}      # sublane packing per dtype byte-width
_MAX_BLOCK_BYTES = 2 * 1024 * 1024           # ~2 MiB/block -> 4 live buffers ~8 MiB
_MIN_SPLIT_BYTES = 256 * 1024                # above this, force >= 2 grid blocks
_MIN_PALLAS_BYTES = 256 * 1024               # below this, plain x*x (XLA fuses it)


def _choose_layout(n_main, itemsize):
    """Lane-dense (rows, cols) slab + row tile for n_main (a multiple of 128) elems."""
    granule = _SUBLANE_GRANULE.get(itemsize, 8)

    # Widest lane count (multiple of 128) that divides n_main exactly while keeping
    # rows >= the sublane granule, so vregs stay fully packed.  128 always divides
    # n_main, so the fallback is the narrowest (best sublane fill) option.
    cols = _LANE
    for c in (2048, 1024, 512, 256, 128):
        if n_main % c == 0 and (n_main // c) >= granule:
            cols = c
            break

    rows = n_main // cols
    slab_bytes = n_main * itemsize

    if slab_bytes <= _MIN_SPLIT_BYTES:
        # Small slab: one full-extent block (full-extent dims are always legal);
        # the pallas_call fixed cost dominates here anyway.
        return cols, rows, rows

    # Row tile targeting ~_MAX_BLOCK_BYTES, a multiple of the sublane granule.
    max_rows = max(granule, (_MAX_BLOCK_BYTES // (cols * itemsize)) // granule * granule)
    # Guarantee >= 2 grid blocks so both v7x TensorCores get work and the
    # double-buffered pipeline can overlap in-DMA / compute / out-DMA.
    half = -(-rows // 2)                      # ceil(rows / 2)
    half = -(-half // granule) * granule      # round up to a granule multiple
    tile_rows = min(max_rows, half)
    if tile_rows >= rows:                     # degenerate guard: keep it legal
        tile_rows = rows
    return cols, rows, tile_rows


def _square_slab(slab, tile_rows):
    rows, cols = slab.shape
    grid = (pl.cdiv(rows, tile_rows),)        # partial final block handled by masking
    return pl.pallas_call(
        _square_kernel,
        out_shape=jax.ShapeDtypeStruct((rows, cols), slab.dtype),
        grid_spec=pltpu.PrefetchScalarGridSpec(
            num_scalar_prefetch=0,
            grid=grid,
            in_specs=[pl.BlockSpec((tile_rows, cols), lambda i: (i, 0))],
            out_specs=pl.BlockSpec((tile_rows, cols), lambda i: (i, 0)),
        ),
        compiler_params=pltpu.CompilerParams(
            dimension_semantics=("parallel",),
        ),
    )(slab)


def square_layer_forward(x, *, force_pallas=False):
    """Elementwise x**2 (forward of `square_layer`) via a Pallas TPU kernel."""
    orig_shape = x.shape
    dtype = x.dtype
    n = x.size
    itemsize = jnp.dtype(dtype).itemsize

    # Tiny tensors: kernel launch + two dedicated HBM round trips dwarf the work;
    # let XLA fuse the square into adjacent ops instead.
    if n == 0 or (n * itemsize < _MIN_PALLAS_BYTES and not force_pallas):
        return x * x

    flat = x.reshape(-1)
    tail = n % _LANE
    n_main = n - tail

    if n_main == 0:
        # Fewer than 128 elements total: nothing lane-aligned to hand the kernel.
        return x * x

    main = flat[:n_main] if tail else flat
    cols, rows, tile_rows = _choose_layout(n_main, itemsize)
    out = _square_slab(main.reshape(rows, cols), tile_rows)
    out_flat = out.reshape(-1)

    if tail:
        # < 128 trailing elements: square with plain XLA instead of padding the
        # whole tensor (pad + final slice would each add a full extra HBM pass).
        t = flat[n_main:]
        out_flat = jnp.concatenate([out_flat, t * t])

    return out_flat.reshape(orig_shape)


if __name__ == "__main__":
    key = jax.random.PRNGKey(0)

    # NCHW input consistent with an SCCNet-style layer input (demo shape, 8 KiB).
    x = jax.random.normal(key, (2, 4, 16, 16), dtype=jnp.float32)
    y = jax.block_until_ready(square_layer_forward(x, force_pallas=True))
    assert y.shape == x.shape and y.dtype == x.dtype
    assert jnp.allclose(y, x ** 2, atol=1e-6, rtol=1e-6)

    # Default path (small-tensor early-out) must match as well.
    y_small = jax.block_until_ready(square_layer_forward(x))
    assert jnp.allclose(y_small, x ** 2, atol=1e-6, rtol=1e-6)

    # Multi-block grid with a masked partial final row-block (288 KiB slab,
    # rows=36, tile_rows=24 -> grid=(2,), second block partially valid).
    x_big = jax.random.normal(jax.random.PRNGKey(1), (2, 4, 96, 96), dtype=jnp.float32)
    y_big = jax.block_until_ready(square_layer_forward(x_big))
    assert jnp.allclose(y_big, x_big ** 2, atol=1e-6, rtol=1e-6)

    # Unaligned (n % 128 != 0) path: lane-aligned bulk in the kernel, XLA tail.
    x_odd = jax.random.normal(jax.random.PRNGKey(2), (2, 4, 33, 25), dtype=jnp.float32)
    y_odd = jax.block_until_ready(square_layer_forward(x_odd, force_pallas=True))
    assert jnp.allclose(y_odd, x_odd ** 2, atol=1e-6, rtol=1e-6)

    print("KERNEL_OK")
</pallas_src>

<mosaic_0001>
module attributes {stable_mosaic.version = 11 : i64} {
  func.func @_square_kernel(%arg0: i32, %arg1: memref<8x256xf32, #tpu.memory_space<vmem>>, %arg2: memref<8x256xf32, #tpu.memory_space<vmem>>) attributes {dimension_semantics = [#tpu.dimension_semantics<parallel>], iteration_bounds = array<i64: 1>, scalar_prefetch = 0 : i64, scratch_operands = 0 : i64, tpu.core_type = #tpu.core_type<tc>, window_params = [{transform_indices = @transform_0, window_bounds = array<i64: 8, 256>}, {transform_indices = @transform_1, window_bounds = array<i64: 8, 256>}]} {
    %c0 = arith.constant 0 : index
    %c0_0 = arith.constant 0 : index
    %0 = vector.load %arg1[%c0, %c0_0] : memref<8x256xf32, #tpu.memory_space<vmem>>, vector<8x256xf32>
    %1 = arith.mulf %0, %0 : vector<8x256xf32>
    %c0_1 = arith.constant 0 : index
    %c0_2 = arith.constant 0 : index
    %2 = vector.load %arg2[%c0_1, %c0_2] : memref<8x256xf32, #tpu.memory_space<vmem>>, vector<8x256xf32>
    tpu.vector_store %arg2[%c0_1, %c0_2], %1 {strides = array<i32>} : memref<8x256xf32, #tpu.memory_space<vmem>>, vector<8x256xf32>,
    return
  }
  func.func @transform_0(%arg0: i32) -> (i32, i32) {
    %c0_i32 = arith.constant 0 : i32
    %c0_i32_0 = arith.constant 0 : i32
    return %arg0, %c0_i32 : i32, i32
  }
  func.func @transform_1(%arg0: i32) -> (i32, i32) {
    %c0_i32 = arith.constant 0 : i32
    %c0_i32_0 = arith.constant 0 : i32
    return %arg0, %c0_i32 : i32, i32
  }
}

</mosaic_0001>

<bundles_post_ra>
// kernel: tpu_custom_call.1
= control target key start
LH: loop header
LB: loop body
LE: loop exit
PB: predicated region body
PF: predicated region fallthrough
CT: control target
= control target key end

     0   :  { %6 = vsyncpa [#allocation3], 0  ;;  %s118_s0 = inlined_call_operand.hbm [shape: f32[8,256], index: 0, kind: input, shape index: {}]   ;;  %s119_s1 = inlined_call_operand.hbm [shape: f32[8,256], index: 1, kind: output, shape index: {}]  }
   0x1   :  { %7 = vsyncpa [#allocation4], 0  ;;  %s13_s8 = sshll.u32 %s118_s0, 4  ;;  %s100_s9 = smov [#allocation2]   ;;  %s14_s8 = int_to_ptr.hbm [resolvable:$true] %s13_s8 }
   0x2   :  { %s15_s10 = sshll.u32 %s100_s9, 4  ;;  %s16_s10 = int_to_ptr.vmem [resolvable:$true] %s15_s10 }
   0x3   :  { %18 = dma.hbm_to_vmem [thread:$0]  %s14_s8, 256, %s16_s10, [#allocation3]  }
   0x4   :  { %96 = dma.done.wait [#allocation3], 256  }
   0x5   :  { %97 = vsyncadd [#allocation3], 4294967040  ;;  %s101_s11 = smov [#allocation5]   ;;  %s36_s15 = sshll.u32 %s119_s1, 4  ;;  %v23_v0 = vld [vmem:[#allocation2] sm:$0xff]  ;;  %v24_v1 = vld [vmem:[#allocation2 + $0x8] sm:$0xff]  ;;  %s37_s15 = int_to_ptr.hbm [resolvable:$true] %s36_s15 }
   0x6   :  { %s34_s12 = sshll.u32 %s101_s11, 4  ;;  %v25_v2 = vmul.f32 %v23_v0, %v23_v0  ;;  %v26_v3 = vmul.f32 %v24_v1, %v24_v1  ;;  %s35_s12 = int_to_ptr.vmem [resolvable:$true] %s34_s12 }
   0x8   :  { %27 = vst [vmem:[#allocation5] sm:$0xff] %v25_v2 }
   0x9   :  { %28 = vst [vmem:[#allocation5 + $0x8] sm:$0xff] %v26_v3 }
   0xa   :  { %39 = dma.vmem_to_hbm [thread:$0]  %s35_s12, 256, %s37_s15, [#allocation4]  }
   0xb   :  { %98 = dma.done.wait [#allocation4], 256  }
   0xc   :  { %99 = vsyncadd [#allocation4], 4294967040 }
   0xd   :  { %44 = vsyncpa [#allocation3], 1 }
   0xe   :  { %45 = vsyncpa [#allocation4], 1 }

</bundles_post_ra>
